<compile_context>
chip_gen: v7x
topology: tpu7x:2x2x1
jax: 0.10.0
libtpu: 0.0.40
codegen_flags: <defaults>
</compile_context>

<pallas_src>
import functools
import math

import jax
import jax.numpy as jnp
from jax.experimental import pallas as pl
from jax.experimental.pallas import tpu as pltpu


# ----------------------------------------------------------------------------
# PE table construction (mirrors the register_buffer in the PyTorch module).
# Built (and cast) once; shape (max_len, 1, d_model) like the torch buffer.
# ----------------------------------------------------------------------------
def make_pe_table(d_model, max_len=5000, dtype=jnp.float32):
    assert d_model % 2 == 0, "d_model must be even (same constraint as the PyTorch module)"
    position = jnp.arange(max_len, dtype=jnp.float32)[:, None]                   # (L, 1)
    div_term = jnp.exp(
        jnp.arange(0, d_model, 2, dtype=jnp.float32) * (-math.log(10000.0) / d_model)
    )                                                                             # (E/2,)
    angles = position * div_term                                                  # (L, E/2)
    pe = jnp.zeros((max_len, d_model), jnp.float32)
    pe = pe.at[:, 0::2].set(jnp.sin(angles))
    pe = pe.at[:, 1::2].set(jnp.cos(angles))
    return pe[:, None, :].astype(dtype)                                           # (L, 1, E)


# ----------------------------------------------------------------------------
# Kernel: x/out blocks are (tS, B*E); pe block is (tS, E).  The batch
# broadcast is B static lane-slices (ref views) + elementwise adds.
# ----------------------------------------------------------------------------
def _pos_encoding_kernel(x_ref, pe_ref, out_ref, *, embed, batch):
    pe = pe_ref[...]                                     # (tS, E)
    for b in range(batch):
        sl = slice(b * embed, (b + 1) * embed)           # static -> zero-cost view
        out_ref[:, sl] = x_ref[:, sl] + pe


# ----------------------------------------------------------------------------
# Generation-aware VMEM budget & sequence-tile sizing.
# ----------------------------------------------------------------------------
def _vmem_budget_bytes():
    try:
        cap = int(getattr(pltpu.get_tpu_info(), "vmem_capacity_bytes", 128 << 20))
    except Exception:
        cap = 128 << 20
    # Leave headroom below physical VMEM, never exceed a 64 MiB scoped limit:
    # v5e/v6e (128 MiB) -> 64 MiB, v7x (64 MiB) -> 48 MiB.
    return min((cap * 3) // 4, 64 << 20)


def _pick_seq_tile(S, row_bytes, block_budget_bytes):
    rows = block_budget_bytes // max(1, row_bytes)
    # If everything fits in a single tile, split into two grid steps so both
    # v7x TensorCores get work (harmless extra ~0.35us step on v5e/v6e), as
    # long as each half stays large.
    half = pl.cdiv(S, 2)
    if rows >= S and half >= 64:
        rows = half
    rows = max(8, min(rows, S))
    return ((rows + 7) // 8) * 8                          # sublane multiple of 8


# ----------------------------------------------------------------------------
# Wrapper
# ----------------------------------------------------------------------------
def positional_encoding(x, pe_table=None, *, max_len=5000, seq_tile=None, donate_x=False):
    """x: (S, B, E).  Returns x + pe[:S] with eval-mode (identity) dropout."""
    S, B, E = x.shape
    if pe_table is None:
        pe_table = make_pe_table(E, max_len=max_len, dtype=x.dtype)
    L = pe_table.shape[0]
    assert L >= S, f"pe table max_len={L} < sequence length {S}"

    pe2 = pe_table.reshape(L, E)                          # drop size-1 dim (free view)
    if pe2.dtype != x.dtype:                              # no-op when table built in x.dtype
        pe2 = pe2.astype(x.dtype)

    x2 = x.reshape(S, B * E)                              # free view: contiguous (S,B,E)

    itemsize = jnp.dtype(x.dtype).itemsize
    vmem_budget = _vmem_budget_bytes()
    if seq_tile is None:
        tS = _pick_seq_tile(S, B * E * itemsize, vmem_budget // 6)
    else:
        tS = ((max(1, min(seq_tile, S)) + 7) // 8) * 8
    grid = (pl.cdiv(S, tS),)

    out2 = pl.pallas_call(
        functools.partial(_pos_encoding_kernel, embed=E, batch=B),
        out_shape=jax.ShapeDtypeStruct((S, B * E), x.dtype),
        grid=grid,
        in_specs=[
            pl.BlockSpec((tS, B * E), lambda i: (i, 0)),  # x  : dense contiguous slab
            pl.BlockSpec((tS, E), lambda i: (i, 0)),      # pe : first cdiv(S,tS) blocks only
        ],
        out_specs=pl.BlockSpec((tS, B * E), lambda i: (i, 0)),
        compiler_params=pltpu.CompilerParams(
            dimension_semantics=("parallel",),            # v7x: shard seq tiles over 2 TCs
            vmem_limit_bytes=vmem_budget,
        ),
        input_output_aliases=({0: 0} if donate_x else {}),
    )(x2, pe2)
    return out2.reshape(S, B, E)


# ----------------------------------------------------------------------------
# Pure-JAX reference (same math as the PyTorch forward, eval mode).
# ----------------------------------------------------------------------------
def reference(x, pe_table):
    return x + pe_table[: x.shape[0]].astype(x.dtype)


if __name__ == "__main__":
    key = jax.random.PRNGKey(0)
    k1, k2, k3 = jax.random.split(key, 3)

    # --- small shapes implied by the module: seq=8, batch=2, embed=32 ---
    S, B, E = 8, 2, 32
    x_small = jax.random.normal(k1, (S, B, E), jnp.float32)
    pe_small = make_pe_table(E, max_len=5000)
    out_small = jax.block_until_ready(positional_encoding(x_small, pe_small))
    ref_small = reference(x_small, pe_small)
    assert out_small.shape == (S, B, E)
    assert jnp.allclose(out_small, ref_small, atol=1e-6, rtol=1e-6)

    # --- larger, tiled case (lane-dense B*E = 512), multi-step pipeline ---
    S2, B2, E2 = 512, 4, 128
    x_big = jax.random.normal(k2, (S2, B2, E2), jnp.float32)
    pe_big = make_pe_table(E2, max_len=1024)
    out_big = jax.block_until_ready(positional_encoding(x_big, pe_big, seq_tile=128))
    ref_big = reference(x_big, pe_big)
    assert out_big.shape == (S2, B2, E2)
    assert jnp.allclose(out_big, ref_big, atol=1e-6, rtol=1e-6)

    # --- ragged last tile (S not a multiple of the sequence tile) ---
    S3, B3, E3 = 200, 2, 128
    x_rag = jax.random.normal(k3, (S3, B3, E3), jnp.float32)
    pe_rag = make_pe_table(E3, max_len=512)
    out_rag = jax.block_until_ready(positional_encoding(x_rag, pe_rag, seq_tile=128))
    ref_rag = reference(x_rag, pe_rag)
    assert out_rag.shape == (S3, B3, E3)
    assert jnp.allclose(out_rag, ref_rag, atol=1e-6, rtol=1e-6)

    print("KERNEL_OK")
</pallas_src>

<mosaic_0001>
module attributes {stable_mosaic.version = 11 : i64} {
  func.func @_pos_encoding_kernel(%arg0: i32, %arg1: memref<8x64xf32, #tpu.memory_space<vmem>>, %arg2: memref<8x32xf32, #tpu.memory_space<vmem>>, %arg3: memref<8x64xf32, #tpu.memory_space<vmem>>) attributes {dimension_semantics = [#tpu.dimension_semantics<parallel>], iteration_bounds = array<i64: 1>, scalar_prefetch = 0 : i64, scratch_operands = 0 : i64, tpu.core_type = #tpu.core_type<tc>, window_params = [{transform_indices = @transform_0, window_bounds = array<i64: 8, 64>}, {transform_indices = @transform_1, window_bounds = array<i64: 8, 32>}, {transform_indices = @transform_2, window_bounds = array<i64: 8, 64>}]} {
    %c0 = arith.constant 0 : index
    %c0_0 = arith.constant 0 : index
    %0 = vector.load %arg2[%c0, %c0_0] : memref<8x32xf32, #tpu.memory_space<vmem>>, vector<8x32xf32>
    %c0_1 = arith.constant 0 : index
    %c0_2 = arith.constant 0 : index
    %1 = vector.load %arg1[%c0_1, %c0_2] : memref<8x64xf32, #tpu.memory_space<vmem>>, vector<8x32xf32>
    %2 = arith.addf %1, %0 : vector<8x32xf32>
    %c0_3 = arith.constant 0 : index
    %c0_4 = arith.constant 0 : index
    %3 = vector.load %arg3[%c0_3, %c0_4] : memref<8x64xf32, #tpu.memory_space<vmem>>, vector<8x32xf32>
    tpu.vector_store %arg3[%c0_3, %c0_4], %2 {strides = array<i32>} : memref<8x64xf32, #tpu.memory_space<vmem>>, vector<8x32xf32>,
    %c0_5 = arith.constant 0 : index
    %c32 = arith.constant 32 : index
    %4 = vector.load %arg1[%c0_5, %c32] : memref<8x64xf32, #tpu.memory_space<vmem>>, vector<8x32xf32>
    %5 = arith.addf %4, %0 : vector<8x32xf32>
    %c0_6 = arith.constant 0 : index
    %c32_7 = arith.constant 32 : index
    %6 = vector.load %arg3[%c0_6, %c32_7] : memref<8x64xf32, #tpu.memory_space<vmem>>, vector<8x32xf32>
    tpu.vector_store %arg3[%c0_6, %c32_7], %5 {strides = array<i32>} : memref<8x64xf32, #tpu.memory_space<vmem>>, vector<8x32xf32>,
    return
  }
  func.func @transform_0(%arg0: i32) -> (i32, i32) {
    %c0_i32 = arith.constant 0 : i32
    %c0_i32_0 = arith.constant 0 : i32
    return %arg0, %c0_i32 : i32, i32
  }
  func.func @transform_1(%arg0: i32) -> (i32, i32) {
    %c0_i32 = arith.constant 0 : i32
    %c0_i32_0 = arith.constant 0 : i32
    return %arg0, %c0_i32 : i32, i32
  }
  func.func @transform_2(%arg0: i32) -> (i32, i32) {
    %c0_i32 = arith.constant 0 : i32
    %c0_i32_0 = arith.constant 0 : i32
    return %arg0, %c0_i32 : i32, i32
  }
}

</mosaic_0001>

<bundles_post_ra>
// kernel: tpu_custom_call.1
= control target key start
LH: loop header
LB: loop body
LE: loop exit
PB: predicated region body
PF: predicated region fallthrough
CT: control target
= control target key end

     0   :  { %7 = vsyncpa [#allocation3], 0  ;;  %s206_s0 = inlined_call_operand.hbm [shape: f32[8,64], index: 0, kind: input, shape index: {}]   ;;  %s207_s1 = inlined_call_operand.hbm [shape: f32[5000,32], index: 1, kind: input, shape index: {}]   ;;  %s208_s2 = inlined_call_operand.hbm [shape: f32[8,64], index: 2, kind: output, shape index: {}]  }
   0x1   :  { %8 = vsyncpa [#allocation6], 0 }
   0x2   :  { %9 = vsyncpa [#allocation4], 0  ;;  %s141_s9 = smov [#allocation2]   ;;  %s142_s11 = smov [#allocation5]  }
   0x3   :  { %s16_s10 = sshll.u32 %s141_s9, 4  ;;  %s26_s12 = sshll.u32 %s142_s11, 4  ;;  %s17_s10 = int_to_ptr.vmem [resolvable:$true] %s16_s10  ;;  %s160_s12 = int_to_ptr.vmem [resolvable:$true] %s26_s12 }
   0x4   :  { %s69_s15 = scalar_lea.hbm %s206_s0, 128 }
   0x5   :  { %p70_p0 = scmp.ne.s32.totalorder %s206_s0, %s69_s15  ;;  %p73_p1 = scmp.lt.u32.totalorder %s69_s15, %s206_s0 }
   0x7   :  { %p75_p2 = pnand %p73_p1, %p70_p0 }
   0x9   :  { %78 = shalt.err (!%p75_p2)
}
   0xa   :  { %s79_s20 = scalar_lea.vmem %s17_s10, 128  ;;  %p84_p4 = scmp.lt.s32.totalorder %s17_s10, %s17_s10 }
   0xb   :  { %p80_p3 = scmp.ne.s32.totalorder %s17_s10, %s79_s20  ;;  %p85_p5 = scmp.lt.s32.totalorder %s79_s20, %s79_s20 }
   0xd   :  { %p86_p6 = por %p85_p5, %p84_p4 }
   0xf   :  { %p87_p7 = pnand %p86_p6, %p80_p3 }
  0x11   :  { %90 = shalt.err (!%p87_p7)
}
  0x12   :  { %19 = dma.hbm_to_vmem [thread:$0]  %s206_s0, 128, %s17_s10, [#allocation3]  }
  0x13   :  { %s91_s25 = scalar_lea.hbm %s207_s1, 128  ;;  %s93_s30 = scalar_lea.hbm %s207_s1, 80000 }
  0x14   :  { %p92_p8 = scmp.ne.s32.totalorder %s207_s1, %s91_s25  ;;  %p94_p9 = scmp.lt.u32.totalorder %s93_s30, %s91_s25 }
  0x15   :  { %p95_p10 = scmp.lt.u32.totalorder %s91_s25, %s207_s1 }
  0x17   :  { %p96_p11 = por %p95_p10, %p94_p9 }
  0x19   :  { %p97_p12 = pnand %p96_p11, %p92_p8 }
  0x1b   :  { %100 = shalt.err (!%p97_p12)
}
  0x1c   :  { %s101_s0 = scalar_lea.vmem %s160_s12, 128  ;;  %p106_p0 = scmp.lt.s32.totalorder %s160_s12, %s160_s12 }
  0x1d   :  { %p102_p13 = scmp.ne.s32.totalorder %s160_s12, %s101_s0  ;;  %p107_p1 = scmp.lt.s32.totalorder %s101_s0, %s101_s0 }
  0x1f   :  { %p108_p2 = por %p107_p1, %p106_p0 }
  0x21   :  { %p109_p3 = pnand %p108_p2, %p102_p13 }
  0x23   :  { %112 = shalt.err (!%p109_p3)
}
  0x24   :  { %29 = dma.hbm_to_vmem [thread:$0]  %s207_s1, 128, %s160_s12, [#allocation6]  }
  0x25   :  { %135 = dma.done.wait [#allocation3], 128  }
  0x26   :  { %136 = vsyncadd [#allocation3], 4294967168 }
  0x27   :  { %137 = dma.done.wait [#allocation6], 128  }
  0x28   :  { %138 = vsyncadd [#allocation6], 4294967168  ;;  %v36_v0 = vld [vmem:[#allocation5] sm:$0xff]  ;;  %v37_v1 = vld [vmem:[#allocation2] sm:$0xff]  ;;  %vm39_vm0 = vcmask 261120   ;;  %s143_s7 = smov 32  }
  0x29   :  { %v38_v2 = vadd.f32 %v37_v1, %v36_v0  ;;  %43 = vrot.lane.b32.xlu0 %v36_v0, %s143_s7  ;;  %s144_s8 = smov [#allocation7]   ;;  %vm47_vm1 = vcmask 523520  }
  0x2a   :  { %s55_s9 = sshll.u32 %s144_s8, 4  ;;  %s56_s9 = int_to_ptr.vmem [resolvable:$true] %s55_s9 }
  0x2b   :  { %40 = vst.msk [vmem:[#allocation7] sm:$0xff] %vm39_vm0, %v38_v2  ;;  %s113_s10 = scalar_lea.vmem %s56_s9, 128  ;;  %p118_p5 = scmp.lt.s32.totalorder %s56_s9, %s56_s9 }
  0x2c   :  { %p114_p4 = scmp.ne.s32.totalorder %s56_s9, %s113_s10  ;;  %p119_p6 = scmp.lt.s32.totalorder %s113_s10, %s113_s10 }
  0x2e   :  { %p120_p7 = por %p119_p6, %p118_p5 }
  0x30   :  { %p121_p8 = pnand %p120_p7, %p114_p4 }
  0x9b   :  { %v44_v3 = vpop.permute.xlu0 %43 }
  0x9c   :  { %v46_v4 = vadd.f32 %v44_v3, %v37_v1 }
  0x9e   :  { %48 = vst.msk [vmem:[#allocation7] sm:$0xff] %vm47_vm1, %v46_v4 }
  0x9f   :  { %124 = shalt.err (!%p121_p8)
}
  0xa0   :  { %s125_s12 = scalar_lea.hbm %s208_s2, 128 }
  0xa1   :  { %p126_p9 = scmp.ne.s32.totalorder %s208_s2, %s125_s12  ;;  %p129_p10 = scmp.lt.u32.totalorder %s125_s12, %s208_s2 }
  0xa3   :  { %p131_p11 = pnand %p129_p10, %p126_p9 }
  0xa5   :  { %134 = shalt.err (!%p131_p11)
}
  0xa6   :  { %58 = dma.vmem_to_hbm [thread:$0]  %s56_s9, 128, %s208_s2, [#allocation4]  }
  0xa7   :  { %139 = dma.done.wait [#allocation4], 128  }
  0xa8   :  { %140 = vsyncadd [#allocation4], 4294967168 }
  0xa9   :  { %62 = vsyncpa [#allocation3], 1 }
  0xaa   :  { %63 = vsyncpa [#allocation6], 1 }
  0xab   :  { %64 = vsyncpa [#allocation4], 1 }

</bundles_post_ra>
